<compile_context>
chip_gen: v7x
topology: tpu7x:2x2x1
jax: 0.10.0
libtpu: 0.0.40
codegen_flags: <defaults>
</compile_context>

<pallas_src>
import jax
import jax.numpy as jnp
from jax.experimental import pallas as pl
from jax.experimental.pallas import tpu as pltpu

HIDDEN = 256
LANES = 128


def _round_up(x: int, m: int) -> int:
    return ((x + m - 1) // m) * m


def _ddqn_kernel(x_ref, w1_ref, b1_ref, w2_ref, b2_ref, w3_ref, b3_ref, o_ref):
    # Whole 3-layer MLP fused per batch tile; weights/biases are VMEM-resident.
    wd = w1_ref.dtype  # bf16 (or f32) MXU input dtype; x arrives already in wd.

    # fc1 + ReLU: bf16 MXU inputs, f32 accumulate, f32 elementwise (v5e-friendly).
    h1 = jnp.dot(x_ref[...], w1_ref[...], preferred_element_type=jnp.float32)
    h1 = jnp.maximum(h1 + b1_ref[...], 0.0)

    # fc2 + ReLU
    h2 = jnp.dot(h1.astype(wd), w2_ref[...], preferred_element_type=jnp.float32)
    h2 = jnp.maximum(h2 + b2_ref[...], 0.0)

    # fc3 (no activation); lane-padded, unmasked lane-dense store (bf16 slab).
    out = jnp.dot(h2.astype(wd), w3_ref[...], preferred_element_type=jnp.float32)
    o_ref[...] = (out + b3_ref[...]).astype(o_ref.dtype)


def _pick_tile_b(B: int, requested: int) -> int:
    """Batch tile: MXU/sublane aligned, <= requested, >= 2 grid steps for big batches."""
    if B <= 256:
        # Single block that exactly equals the full batch dim (exempt from the
        # (8,128) divisibility rule, no ragged/padded rows).
        return B
    t = max(LANES, min(_round_up(requested, LANES), _round_up(B, LANES)))
    # Keep at least 2 grid steps so v7x's two TensorCores both get work
    # ("parallel" batch axis); harmless on single-TC v5e/v6e.
    t = min(t, max(LANES, _round_up((B + 1) // 2, LANES)))
    return t


def _vmem_limit_bytes(tile_b: int, features: int, out_pad: int, params,
                      out_dtype) -> int:
    in_bytes = jnp.dtype(params["w1"].dtype).itemsize
    out_bytes = jnp.dtype(out_dtype).itemsize
    lane_f = _round_up(features, LANES)
    # x / out tiles, double-buffered by the BlockSpec pipeline (lane-padded in VMEM).
    io = 2 * tile_b * (lane_f * in_bytes + out_pad * out_bytes)
    # f32 h1/h2 intermediates plus the bf16 copies fed back into the MXU.
    act = 2 * tile_b * HIDDEN * (4 + in_bytes)
    # Resident weights/biases: count 2x (two buffers per input spec).
    w = 2 * sum(int(v.size) * jnp.dtype(v.dtype).itemsize for v in params.values())
    total = io + act + w + (4 << 20)  # headroom for DMA descriptors / regalloc
    try:
        physical = int(pltpu.get_tpu_info().vmem_capacity_bytes)
    except Exception:
        physical = 64 << 20  # conservative: v7x per-TC VMEM
    cap = max(32 << 20, physical - (16 << 20))   # gen-aware ceiling w/ headroom
    return min(max(total, 32 << 20), cap)        # never below the common default


def ddqn_forward(x, params, outputs: int, *, tile_b: int = 2048,
                 out_store_dtype=jnp.bfloat16):
    """DDQN forward via a single fused Pallas kernel, tiled over the batch.

    x:       [B, features]  (any float dtype; MXU is fed the weight dtype, f32 accumulate)
    params:  dict from init_ddqn_params (weights [in, out], fc3 lane-padded)
    outputs: true number of Q-value outputs (columns beyond this are zero pad)
    returns: [B, outputs] float32
    """
    B, F = x.shape
    out_pad = params["w3"].shape[1]
    wd = params["w1"].dtype

    # Wrapper-side cast to the MXU input dtype: halves x DMA, removes in-kernel casts.
    x = x.astype(wd)

    tb = _pick_tile_b(B, tile_b)
    grid = (pl.cdiv(B, tb),)  # ragged final block handled by block clipping (no jnp.pad)

    resident = lambda shape: pl.BlockSpec(shape, lambda i: (0, 0))  # stays in VMEM

    out = pl.pallas_call(
        _ddqn_kernel,
        out_shape=jax.ShapeDtypeStruct((B, out_pad), out_store_dtype),
        grid=grid,
        in_specs=[
            pl.BlockSpec((tb, F), lambda i: (i, 0)),      # x: tiled over batch
            resident(params["w1"].shape),
            resident(params["b1"].shape),
            resident(params["w2"].shape),
            resident(params["b2"].shape),
            resident(params["w3"].shape),
            resident(params["b3"].shape),
        ],
        out_specs=pl.BlockSpec((tb, out_pad), lambda i: (i, 0)),
        compiler_params=pltpu.CompilerParams(
            dimension_semantics=("parallel",),            # both TCs on v7x
            vmem_limit_bytes=_vmem_limit_bytes(tb, F, out_pad, params,
                                               out_store_dtype),
        ),
    )(
        x,
        params["w1"], params["b1"],
        params["w2"], params["b2"],
        params["w3"], params["b3"],
    )

    # Slice off lane padding, return f32 Q-values (fuses with consumers under jit).
    # TODO(synk): for pure action selection, fuse argmax into the kernel so the
    # padded Q slab never hits HBM.
    return out[:, :outputs].astype(jnp.float32)


def init_ddqn_params(key, features: int, outputs: int, weight_dtype=jnp.bfloat16):
    """Init matching PyTorch nn.Linear default (U[-1/sqrt(fan_in), +1/sqrt(fan_in)]).

    Weights stored transposed ([in, out]) in `weight_dtype` (bf16 by default);
    biases stored f32. fc3's output dim is zero-padded to a multiple of 128 lanes.
    """
    keys = jax.random.split(key, 6)

    def linear(kw, kb, fan_in, fan_out, pad_out=None):
        bound = 1.0 / float(fan_in) ** 0.5
        w = jax.random.uniform(kw, (fan_in, fan_out), jnp.float32, -bound, bound)
        b = jax.random.uniform(kb, (1, fan_out), jnp.float32, -bound, bound)
        if pad_out is not None and pad_out != fan_out:
            w = jnp.pad(w, ((0, 0), (0, pad_out - fan_out)))
            b = jnp.pad(b, ((0, 0), (0, pad_out - fan_out)))
        return w.astype(weight_dtype), b  # bias stays f32 (f32 elementwise path)

    out_pad = _round_up(outputs, LANES)
    w1, b1 = linear(keys[0], keys[1], features, HIDDEN)
    w2, b2 = linear(keys[2], keys[3], HIDDEN, HIDDEN)
    w3, b3 = linear(keys[4], keys[5], HIDDEN, outputs, pad_out=out_pad)
    return {"w1": w1, "b1": b1, "w2": w2, "b2": b2, "w3": w3, "b3": b3}


# TODO(synk): DDQN.save/load (torch state_dict serialization) has no Pallas
# equivalent; persistence is out of scope for the forward kernel.

if __name__ == "__main__":
    key = jax.random.PRNGKey(0)
    k_params, k_x1, k_x2 = jax.random.split(key, 3)

    FEATURES = 32   # DDQN(features=32, outputs=8)
    OUTPUTS = 8

    params = init_ddqn_params(k_params, FEATURES, OUTPUTS)

    # Pure-JAX reference using the same bf16 weights / bf16 MXU inputs, f32 accumulate.
    def ref(x, p, outputs):
        wd = p["w1"].dtype
        h = x.astype(wd)
        h1 = jnp.maximum(
            jnp.dot(h, p["w1"], preferred_element_type=jnp.float32) + p["b1"], 0.0)
        h2 = jnp.maximum(
            jnp.dot(h1.astype(wd), p["w2"], preferred_element_type=jnp.float32) + p["b2"], 0.0)
        o = jnp.dot(h2.astype(wd), p["w3"], preferred_element_type=jnp.float32) + p["b3"]
        return o[:, :outputs]

    def check(batch, key_x):
        x = jax.random.normal(key_x, (batch, FEATURES), dtype=jnp.float32)
        out = ddqn_forward(x, params, OUTPUTS)
        jax.block_until_ready(out)
        expected = ref(x, params, OUTPUTS)
        assert out.shape == (batch, OUTPUTS)
        assert jnp.allclose(out, expected, atol=2e-2, rtol=2e-2), (
            batch, float(jnp.max(jnp.abs(out - expected))))

    check(8, k_x1)     # small action-selection batch: single exact block
    check(300, k_x2)   # replay-style batch: 2 grid steps, ragged last block

    print("KERNEL_OK")
</pallas_src>

<mosaic_0001>
module attributes {stable_mosaic.version = 11 : i64} {
  func.func @_ddqn_kernel(%arg0: i32, %arg1: memref<8x32xbf16, #tpu.memory_space<vmem>>, %arg2: memref<32x256xbf16, #tpu.memory_space<vmem>>, %arg3: memref<1x256xf32, #tpu.memory_space<vmem>>, %arg4: memref<256x256xbf16, #tpu.memory_space<vmem>>, %arg5: memref<1x256xf32, #tpu.memory_space<vmem>>, %arg6: memref<256x128xbf16, #tpu.memory_space<vmem>>, %arg7: memref<1x128xf32, #tpu.memory_space<vmem>>, %arg8: memref<8x128xbf16, #tpu.memory_space<vmem>>) attributes {dimension_semantics = [#tpu.dimension_semantics<parallel>], iteration_bounds = array<i64: 1>, scalar_prefetch = 0 : i64, scratch_operands = 0 : i64, tpu.core_type = #tpu.core_type<tc>, window_params = [{transform_indices = @transform_0, window_bounds = array<i64: 8, 32>}, {pipeline_mode = #tpu.pipeline_mode<synchronous>, transform_indices = @transform_1, window_bounds = array<i64: 32, 256>}, {pipeline_mode = #tpu.pipeline_mode<synchronous>, transform_indices = @transform_2, window_bounds = array<i64: 1, 256>}, {pipeline_mode = #tpu.pipeline_mode<synchronous>, transform_indices = @transform_3, window_bounds = array<i64: 256, 256>}, {pipeline_mode = #tpu.pipeline_mode<synchronous>, transform_indices = @transform_4, window_bounds = array<i64: 1, 256>}, {pipeline_mode = #tpu.pipeline_mode<synchronous>, transform_indices = @transform_5, window_bounds = array<i64: 256, 128>}, {pipeline_mode = #tpu.pipeline_mode<synchronous>, transform_indices = @transform_6, window_bounds = array<i64: 1, 128>}, {transform_indices = @transform_7, window_bounds = array<i64: 8, 128>}]} {
    %c0 = arith.constant 0 : index
    %c0_0 = arith.constant 0 : index
    %0 = vector.load %arg1[%c0, %c0_0] : memref<8x32xbf16, #tpu.memory_space<vmem>>, vector<8x32xbf16>
    %c0_1 = arith.constant 0 : index
    %c0_2 = arith.constant 0 : index
    %1 = vector.load %arg2[%c0_1, %c0_2] : memref<32x256xbf16, #tpu.memory_space<vmem>>, vector<32x256xbf16>
    %cst = arith.constant dense<0.000000e+00> : vector<8x256xf32>
    %2 = tpu.matmul %0, %1, %cst {dimension_numbers = #tpu.dot_dimension_numbers<[1], [0], [0], [1], [0, 0, 1, 1], [], []>} : vector<8x32xbf16>, vector<32x256xbf16>, vector<8x256xf32> -> vector<8x256xf32>
    %c0_3 = arith.constant 0 : index
    %c0_4 = arith.constant 0 : index
    %3 = vector.load %arg3[%c0_3, %c0_4] : memref<1x256xf32, #tpu.memory_space<vmem>>, vector<1x256xf32>
    %4 = vector.broadcast %3 : vector<1x256xf32> to vector<8x256xf32>
    %5 = arith.addf %2, %4 : vector<8x256xf32>
    %cst_5 = arith.constant 0.000000e+00 : f32
    %6 = vector.broadcast %cst_5 : f32 to vector<8x256xf32>
    %7 = arith.maximumf %5, %6 : vector<8x256xf32>
    %8 = arith.truncf %7 : vector<8x256xf32> to vector<8x256xbf16>
    %c0_6 = arith.constant 0 : index
    %c0_7 = arith.constant 0 : index
    %9 = vector.load %arg4[%c0_6, %c0_7] : memref<256x256xbf16, #tpu.memory_space<vmem>>, vector<256x256xbf16>
    %cst_8 = arith.constant dense<0.000000e+00> : vector<8x256xf32>
    %10 = tpu.matmul %8, %9, %cst_8 {dimension_numbers = #tpu.dot_dimension_numbers<[1], [0], [0], [1], [0, 0, 1, 1], [], []>} : vector<8x256xbf16>, vector<256x256xbf16>, vector<8x256xf32> -> vector<8x256xf32>
    %c0_9 = arith.constant 0 : index
    %c0_10 = arith.constant 0 : index
    %11 = vector.load %arg5[%c0_9, %c0_10] : memref<1x256xf32, #tpu.memory_space<vmem>>, vector<1x256xf32>
    %12 = vector.broadcast %11 : vector<1x256xf32> to vector<8x256xf32>
    %13 = arith.addf %10, %12 : vector<8x256xf32>
    %cst_11 = arith.constant 0.000000e+00 : f32
    %14 = vector.broadcast %cst_11 : f32 to vector<8x256xf32>
    %15 = arith.maximumf %13, %14 : vector<8x256xf32>
    %16 = arith.truncf %15 : vector<8x256xf32> to vector<8x256xbf16>
    %c0_12 = arith.constant 0 : index
    %c0_13 = arith.constant 0 : index
    %17 = vector.load %arg6[%c0_12, %c0_13] : memref<256x128xbf16, #tpu.memory_space<vmem>>, vector<256x128xbf16>
    %cst_14 = arith.constant dense<0.000000e+00> : vector<8x128xf32>
    %18 = tpu.matmul %16, %17, %cst_14 {dimension_numbers = #tpu.dot_dimension_numbers<[1], [0], [0], [1], [0, 0, 1, 1], [], []>} : vector<8x256xbf16>, vector<256x128xbf16>, vector<8x128xf32> -> vector<8x128xf32>
    %c0_15 = arith.constant 0 : index
    %c0_16 = arith.constant 0 : index
    %19 = vector.load %arg7[%c0_15, %c0_16] : memref<1x128xf32, #tpu.memory_space<vmem>>, vector<1x128xf32>
    %20 = vector.broadcast %19 : vector<1x128xf32> to vector<8x128xf32>
    %21 = arith.addf %18, %20 : vector<8x128xf32>
    %22 = arith.truncf %21 : vector<8x128xf32> to vector<8x128xbf16>
    %c0_17 = arith.constant 0 : index
    %c0_18 = arith.constant 0 : index
    %23 = vector.load %arg8[%c0_17, %c0_18] : memref<8x128xbf16, #tpu.memory_space<vmem>>, vector<8x128xbf16>
    tpu.vector_store %arg8[%c0_17, %c0_18], %22 {strides = array<i32>} : memref<8x128xbf16, #tpu.memory_space<vmem>>, vector<8x128xbf16>,
    return
  }
  func.func @transform_0(%arg0: i32) -> (i32, i32) {
    %c0_i32 = arith.constant 0 : i32
    %c0_i32_0 = arith.constant 0 : i32
    return %arg0, %c0_i32 : i32, i32
  }
  func.func @transform_1(%arg0: i32) -> (i32, i32) {
    %c0_i32 = arith.constant 0 : i32
    %c0_i32_0 = arith.constant 0 : i32
    %c0_i32_1 = arith.constant 0 : i32
    return %c0_i32, %c0_i32_0 : i32, i32
  }
  func.func @transform_2(%arg0: i32) -> (i32, i32) {
    %c0_i32 = arith.constant 0 : i32
    %c0_i32_0 = arith.constant 0 : i32
    %c0_i32_1 = arith.constant 0 : i32
    return %c0_i32, %c0_i32_0 : i32, i32
  }
  func.func @transform_3(%arg0: i32) -> (i32, i32) {
    %c0_i32 = arith.constant 0 : i32
    %c0_i32_0 = arith.constant 0 : i32
    %c0_i32_1 = arith.constant 0 : i32
    return %c0_i32, %c0_i32_0 : i32, i32
  }
  func.func @transform_4(%arg0: i32) -> (i32, i32) {
    %c0_i32 = arith.constant 0 : i32
    %c0_i32_0 = arith.constant 0 : i32
    %c0_i32_1 = arith.constant 0 : i32
    return %c0_i32, %c0_i32_0 : i32, i32
  }
  func.func @transform_5(%arg0: i32) -> (i32, i32) {
    %c0_i32 = arith.constant 0 : i32
    %c0_i32_0 = arith.constant 0 : i32
    %c0_i32_1 = arith.constant 0 : i32
    return %c0_i32, %c0_i32_0 : i32, i32
  }
  func.func @transform_6(%arg0: i32) -> (i32, i32) {
    %c0_i32 = arith.constant 0 : i32
    %c0_i32_0 = arith.constant 0 : i32
    %c0_i32_1 = arith.constant 0 : i32
    return %c0_i32, %c0_i32_0 : i32, i32
  }
  func.func @transform_7(%arg0: i32) -> (i32, i32) {
    %c0_i32 = arith.constant 0 : i32
    %c0_i32_0 = arith.constant 0 : i32
    return %arg0, %c0_i32 : i32, i32
  }
}

</mosaic_0001>

<bundles_post_ra>
// kernel: tpu_custom_call.1
= control target key start
LH: loop header
LB: loop body
LE: loop exit
PB: predicated region body
PF: predicated region fallthrough
CT: control target
= control target key end

     0   :  { %12 = vsyncpa [#allocation3], 0  ;;  %s1009_s0 = inlined_call_operand.hbm [shape: bf16[8,32], index: 0, kind: input, shape index: {}]   ;;  %s1010_s1 = inlined_call_operand.hbm [shape: bf16[32,256], index: 1, kind: input, shape index: {}]   ;;  %s1011_s2 = inlined_call_operand.vmem [shape: f32[1,256], index: 2, kind: input, shape index: {}]   ;;  %s1012_s3 = inlined_call_operand.hbm [shape: bf16[256,256], index: 3, kind: input, shape index: {}]   ;;  %s1013_s4 = inlined_call_operand.vmem [shape: f32[1,256], index: 4, kind: input, shape index: {}]   ;;  %s1014_s5 = inlined_call_operand.hbm [shape: bf16[256,128], index: 5, kind: input, shape index: {}]   ;;  %s1015_s6 = inlined_call_operand.vmem [shape: f32[1,128], index: 6, kind: input, shape index: {}]   ;;  %s1016_s7 = inlined_call_operand.hbm [shape: bf16[8,128], index: 7, kind: output, shape index: {}]  }
   0x1   :  { %13 = vsyncpa [#allocation6], 0 }
   0x2   :  { %14 = vsyncpa [#allocation9], 0 }
   0x3   :  { %15 = vsyncpa [#allocation4], 0  ;;  %s884_s24 = smov [#allocation5]   ;;  %s766_s28 = scalar_lea.hbm %s1010_s1, 512 }
   0x4   :  { %s31_s25 = sshll.u32 %s884_s24, 4  ;;  %p767_p0 = scmp.ne.s32.totalorder %s1010_s1, %s766_s28  ;;  %s32_s25 = int_to_ptr.vmem [resolvable:$true] %s31_s25 }
   0x5   :  { %p770_p1 = scmp.lt.u32.totalorder %s766_s28, %s1010_s1 }
   0x7   :  { %p772_p2 = pnand %p770_p1, %p767_p0 }
   0x9   :  { %775 = shalt.err (!%p772_p2)
}
   0xa   :  { %s776_s10 = scalar_lea.vmem %s32_s25, 512  ;;  %p781_p4 = scmp.lt.s32.totalorder %s32_s25, %s32_s25 }
   0xb   :  { %p777_p3 = scmp.ne.s32.totalorder %s32_s25, %s776_s10  ;;  %p782_p5 = scmp.lt.s32.totalorder %s776_s10, %s776_s10 }
   0xd   :  { %p783_p6 = por %p782_p5, %p781_p4 }
   0xf   :  { %p784_p7 = pnand %p783_p6, %p777_p3 }
  0x11   :  { %787 = shalt.err (!%p784_p7)
}
  0x12   :  { %s885_s11 = smov 128   ;;  %s886_s12 = smov 8  }
  0x13   :  { %37 = dma.hbm_to_vmem [thread:$0]  %s1010_s1, 512, %s32_s25, [#allocation6], %s885_s11, %s885_s11, %s886_s12  }
  0x14   :  { %s887_s15 = smov [#allocation2]   ;;  %s888_s17 = smov [#allocation7]  }
  0x15   :  { %s22_s16 = sshll.u32 %s887_s15, 4  ;;  %s45_s18 = sshll.u32 %s888_s17, 4  ;;  %s23_s16 = int_to_ptr.vmem [resolvable:$true] %s22_s16  ;;  %s46_s18 = int_to_ptr.vmem [resolvable:$true] %s45_s18 }
  0x16   :  { %s788_s21 = scalar_lea.hbm %s1009_s0, 64 }
  0x17   :  { %p789_p8 = scmp.ne.s32.totalorder %s1009_s0, %s788_s21  ;;  %p792_p9 = scmp.lt.u32.totalorder %s788_s21, %s1009_s0 }
  0x19   :  { %p794_p10 = pnand %p792_p9, %p789_p8 }
  0x1b   :  { %797 = shalt.err (!%p794_p10)
}
  0x1c   :  { %s798_s1 = scalar_lea.vmem %s23_s16, 64  ;;  %p803_p12 = scmp.lt.s32.totalorder %s23_s16, %s23_s16 }
  0x1d   :  { %p799_p11 = scmp.ne.s32.totalorder %s23_s16, %s798_s1  ;;  %p804_p13 = scmp.lt.s32.totalorder %s798_s1, %s798_s1 }
  0x1f   :  { %p805_p0 = por %p804_p13, %p803_p12 }
  0x21   :  { %p806_p1 = pnand %p805_p0, %p799_p11 }
  0x23   :  { %809 = shalt.err (!%p806_p1)
}
  0x24   :  { %25 = dma.hbm_to_vmem [thread:$0]  %s1009_s0, 64, %s23_s16, [#allocation3]  }
  0x25   :  { %s810_s30 = scalar_lea.hbm %s1012_s3, 4096 }
  0x26   :  { %p811_p2 = scmp.ne.s32.totalorder %s1012_s3, %s810_s30  ;;  %p814_p3 = scmp.lt.u32.totalorder %s810_s30, %s1012_s3 }
  0x28   :  { %p816_p4 = pnand %p814_p3, %p811_p2 }
  0x2a   :  { %819 = shalt.err (!%p816_p4)
}
  0x2b   :  { %s820_s14 = scalar_lea.vmem %s46_s18, 4096  ;;  %p825_p6 = scmp.lt.s32.totalorder %s46_s18, %s46_s18 }
  0x2c   :  { %p821_p5 = scmp.ne.s32.totalorder %s46_s18, %s820_s14  ;;  %p826_p7 = scmp.lt.s32.totalorder %s820_s14, %s820_s14 }
  0x2e   :  { %p827_p8 = por %p826_p7, %p825_p6 }
  0x30   :  { %p828_p9 = pnand %p827_p8, %p821_p5 }
  0x32   :  { %831 = shalt.err (!%p828_p9)
}
  0x33   :  { %51 = dma.hbm_to_vmem [thread:$0]  %s1012_s3, 4096, %s46_s18, [#allocation6], %s885_s11, %s885_s11, %s886_s12  }
  0x34   :  { %s889_s16 = smov [#allocation8]   ;;  %s832_s21 = scalar_lea.hbm %s1014_s5, 2048 }
  0x35   :  { %s59_s17 = sshll.u32 %s889_s16, 4  ;;  %p833_p10 = scmp.ne.s32.totalorder %s1014_s5, %s832_s21  ;;  %s60_s17 = int_to_ptr.vmem [resolvable:$true] %s59_s17 }
  0x36   :  { %p836_p11 = scmp.lt.u32.totalorder %s832_s21, %s1014_s5 }
  0x38   :  { %p838_p12 = pnand %p836_p11, %p833_p10 }
  0x3a   :  { %841 = shalt.err (!%p838_p12)
}
  0x3b   :  { %s842_s1 = scalar_lea.vmem %s60_s17, 2048  ;;  %p847_p0 = scmp.lt.s32.totalorder %s60_s17, %s60_s17 }
  0x3c   :  { %p843_p13 = scmp.ne.s32.totalorder %s60_s17, %s842_s1  ;;  %p848_p1 = scmp.lt.s32.totalorder %s842_s1, %s842_s1 }
  0x3e   :  { %p849_p2 = por %p848_p1, %p847_p0 }
  0x40   :  { %p850_p3 = pnand %p849_p2, %p843_p13 }
  0x42   :  { %853 = shalt.err (!%p850_p3)
}
  0x43   :  { %s890_s3 = smov 64   ;;  %s891_s11 = smov 4  }
  0x44   :  { %65 = dma.hbm_to_vmem [thread:$0]  %s1014_s5, 2048, %s60_s17, [#allocation9], %s890_s3, %s890_s3, %s891_s11  }
  0x45   :  { %876 = dma.done.wait [#allocation3], 64  }
  0x46   :  { %877 = vsyncadd [#allocation3], 4294967232 }
  0x47   :  { %878 = dma.done.wait [#allocation6], 4608  }
  0x48   :  { %879 = vsyncadd [#allocation6], 4294962688 }
  0x49   :  { %880 = dma.done.wait [#allocation9], 2048  }
  0x4a   :  { %881 = vsyncadd [#allocation9], 4294965248  ;;  %v892_v0 = vmov 0   ;;  %v696_v1 = vld [vmem:[#allocation5 + $0x4] ss:$8 sps:$4 sm:$0xff]   ;;  %vm118_vm0 = vcmask 261120   ;;  %v88_v50 = vlaneseq }
  0x4b   :  { %154 = vmatprep.mubr.bf16.mxu0 %v892_v0  ;;  %v698_v2 = vld [vmem:[#allocation5] ss:$8 sps:$4 sm:$0xff]   ;;  %122 = vmatprep.subr.bf16.mxu0 %v696_v1  ;;  %v699_v3 = vld [vmem:[#allocation5 + $0x14] ss:$8 sps:$4 sm:$0xff]   ;;  %v701_v4 = vld [vmem:[#allocation5 + $0x10] ss:$8 sps:$4 sm:$0xff]  }
  0x4c   :  { %123 = vmatpush1.bf16.msra.mxu0 %v698_v2  ;;  %v702_v5 = vld [vmem:[#allocation7 + $0x4] ss:$8 sps:$4 sm:$0xff]   ;;  %v704_v6 = vld [vmem:[#allocation7] ss:$8 sps:$4 sm:$0xff]   ;;  %v705_v7 = vld [vmem:[#allocation7 + $0x14] ss:$8 sps:$4 sm:$0xff]  }
  0x4d   :  { %124 = vmatprep.subr.bf16.mxu0 %v699_v3  ;;  %371 = vmatprep.subr.bf16.mxu1 %v702_v5  ;;  %v81_v8 = vld [vmem:[#allocation2] sm:$0xf]  ;;  %v707_v9 = vld [vmem:[#allocation7 + $0x10] ss:$8 sps:$4 sm:$0xff]   ;;  %v708_v10 = vld [vmem:[#allocation7 + $0x24] ss:$8 sps:$4 sm:$0xff]  }
  0x4e   :  { %372 = vmatpush1.bf16.msra.mxu1 %v704_v6  ;;  %v710_v11 = vld [vmem:[#allocation7 + $0x20] ss:$8 sps:$4 sm:$0xff]   ;;  %v711_v12 = vld [vmem:[#allocation7 + $0x34] ss:$8 sps:$4 sm:$0xff]   ;;  %v713_v13 = vld [vmem:[#allocation7 + $0x30] ss:$8 sps:$4 sm:$0xff]  }
  0x4f   :  { %373 = vmatprep.subr.bf16.mxu1 %v705_v7  ;;  %v714_v14 = vld [vmem:[#allocation7 + $0x44] ss:$8 sps:$4 sm:$0xff]   ;;  %v716_v15 = vld [vmem:[#allocation7 + $0x40] ss:$8 sps:$4 sm:$0xff]   ;;  %v717_v16 = vld [vmem:[#allocation7 + $0x54] ss:$8 sps:$4 sm:$0xff]  }
  0x50   :  { %125 = vmatpush1.bf16.msra.mxu0 %v701_v4  ;;  %v719_v17 = vld [vmem:[#allocation7 + $0x50] ss:$8 sps:$4 sm:$0xff]   ;;  %v720_v18 = vld [vmem:[#allocation7 + $0x64] ss:$8 sps:$4 sm:$0xff]   ;;  %v722_v19 = vld [vmem:[#allocation7 + $0x60] ss:$8 sps:$4 sm:$0xff]  }
  0x51   :  { %v723_v20 = vld [vmem:[#allocation7 + $0x74] ss:$8 sps:$4 sm:$0xff]   ;;  %v725_v21 = vld [vmem:[#allocation7 + $0x70] ss:$8 sps:$4 sm:$0xff]   ;;  %v726_v22 = vld [vmem:[#allocation7 + $0x84] ss:$8 sps:$4 sm:$0xff]  }
  0x52   :  { %374 = vmatpush1.bf16.msra.mxu1 %v707_v9  ;;  %v728_v23 = vld [vmem:[#allocation7 + $0x80] ss:$8 sps:$4 sm:$0xff]   ;;  %v729_v24 = vld [vmem:[#allocation7 + $0x94] ss:$8 sps:$4 sm:$0xff]   ;;  %v731_v25 = vld [vmem:[#allocation7 + $0x90] ss:$8 sps:$4 sm:$0xff]  }
  0x53   :  { %614 = vmatmul.mubr.msk.bf16.vlgmr.msra.gmra.mrb[0].mxu0 %vm118_vm0, %v81_v8  ;;  %375 = vmatprep.subr.bf16.mxu1 %v708_v10  ;;  %v732_v26 = vld [vmem:[#allocation7 + $0xa4] ss:$8 sps:$4 sm:$0xff]   ;;  %v734_v27 = vld [vmem:[#allocation7 + $0xa0] ss:$8 sps:$4 sm:$0xff]   ;;  %v735_v28 = vld [vmem:[#allocation7 + $0xb4] ss:$8 sps:$4 sm:$0xff]  }
  0x54   :  { %v737_v29 = vld [vmem:[#allocation7 + $0xb0] ss:$8 sps:$4 sm:$0xff]   ;;  %v738_v30 = vld [vmem:[#allocation7 + $0xc4] ss:$8 sps:$4 sm:$0xff]   ;;  %v740_v31 = vld [vmem:[#allocation7 + $0xc0] ss:$8 sps:$4 sm:$0xff]  }
  0x55   :  { %v741_v32 = vld [vmem:[#allocation7 + $0xd4] ss:$8 sps:$4 sm:$0xff]   ;;  %v743_v33 = vld [vmem:[#allocation7 + $0xd0] ss:$8 sps:$4 sm:$0xff]   ;;  %v744_v34 = vld [vmem:[#allocation7 + $0xe4] ss:$8 sps:$4 sm:$0xff]  }
  0x56   :  { %376 = vmatpush1.bf16.msra.mxu1 %v710_v11  ;;  %v746_v35 = vld [vmem:[#allocation7 + $0xe0] ss:$8 sps:$4 sm:$0xff]   ;;  %v747_v36 = vld [vmem:[#allocation7 + $0xf4] ss:$8 sps:$4 sm:$0xff]   ;;  %v749_v37 = vld [vmem:[#allocation7 + $0xf0] ss:$8 sps:$4 sm:$0xff]  }
  0x57   :  { %377 = vmatprep.subr.bf16.mxu1 %v711_v12  ;;  %v750_v38 = vld [vmem:[#allocation8 + $0x40] sm:$0xff]   ;;  %v752_v40 = vld [vmem:[#allocation8 + $0x48] sm:$0xff]   ;;  %v754_v42 = vld [vmem:[#allocation8 + $0x50] sm:$0xff]   ;;  %v89_v51 = vshrl.u32 %v88_v50, 7 }
  0x58   :  { %v751_v39 = vld [vmem:[#allocation8] sm:$0xff]   ;;  %664 = vmatprep.subr.bf16.mxu0 %v750_v38  ;;  %v753_v41 = vld [vmem:[#allocation8 + $0x8] sm:$0xff]   ;;  %v755_v43 = vld [vmem:[#allocation8 + $0x10] sm:$0xff]  }
  0x59   :  { %665 = vmatpush3.bf16.msra.mxu0 %v751_v39  ;;  %v756_v44 = vld [vmem:[#allocation8 + $0x58] sm:$0xff]   ;;  %v758_v46 = vld [vmem:[#allocation8 + $0x60] sm:$0xff]   ;;  %v760_v48 = vld [vmem:[#allocation8 + $0x68] sm:$0xff]   ;;  %v90_v52 = vsub.s32 0, %v89_v51  ;;  %v94_v54 = vsub.s32 1, %v89_v51 }
  0x5a   :  { %378 = vmatpush1.bf16.msra.mxu1 %v713_v13  ;;  %666 = vmatprep.subr.bf16.mxu0 %v752_v40  ;;  %v757_v45 = vld [vmem:[#allocation8 + $0x18] sm:$0xff]   ;;  %v759_v47 = vld [vmem:[#allocation8 + $0x20] sm:$0xff]   ;;  %v761_v49 = vld [vmem:[#allocation8 + $0x28] sm:$0xff]  }
  0x5b   :  { %379 = vmatprep.subr.bf16.mxu1 %v714_v14  ;;  %v86_v53 = vld [vmem:[%s1011_s2] sm:$0x3]  ;;  %v762_v3 = vld [vmem:[#allocation8 + $0x70] sm:$0xff]  }
  0x5c   :  { %v91_v55 = vrot.slane %v86_v53, %v90_v52  ;;  %v95_v56 = vrot.slane %v86_v53, %v94_v54  ;;  %v763_v4 = vld [vmem:[#allocation8 + $0x30] sm:$0xff]   ;;  %v764_v5 = vld [vmem:[#allocation8 + $0x78] sm:$0xff]  }
  0x5d   :  { %667 = vmatpush3.bf16.msra.mxu0 %v753_v41  ;;  %v765_v6 = vld [vmem:[#allocation8 + $0x38] sm:$0xff]  }
  0x5e   :  { %380 = vmatpush1.bf16.msra.mxu1 %v716_v15  ;;  %668 = vmatprep.subr.bf16.mxu0 %v754_v42  ;;  %v199_v7 = vld [vmem:[%s1013_s4] sm:$0x3]  ;;  %s893_s4 = smov [#allocation10]  }
  0x5f   :  { %381 = vmatprep.subr.bf16.mxu1 %v717_v16  ;;  %v204_v8 = vrot.slane %v199_v7, %v90_v52  ;;  %v208_v9 = vrot.slane %v199_v7, %v94_v54  ;;  %s599_s30 = sshll.u32 %s893_s4, 4  ;;  %s600_s30 = int_to_ptr.vmem [resolvable:$true] %s599_s30 }
  0x60   :  { %s854_s8 = scalar_lea.vmem %s600_s30, 64  ;;  %p859_p5 = scmp.lt.s32.totalorder %s600_s30, %s600_s30 }
  0x61   :  { %669 = vmatpush3.bf16.msra.mxu0 %v755_v43  ;;  %p855_p4 = scmp.ne.s32.totalorder %s600_s30, %s854_s8  ;;  %p860_p6 = scmp.lt.s32.totalorder %s854_s8, %s854_s8 }
  0x62   :  { %382 = vmatpush1.bf16.msra.mxu1 %v719_v17  ;;  %670 = vmatprep.subr.bf16.mxu0 %v756_v44 }
  0x63   :  { %383 = vmatprep.subr.bf16.mxu1 %v720_v18  ;;  %p861_p7 = por %p860_p6, %p859_p5 }
  0x65   :  { %671 = vmatpush3.bf16.msra.mxu0 %v757_v45  ;;  %p862_p8 = pnand %p861_p7, %p855_p4 }
  0x66   :  { %384 = vmatpush1.bf16.msra.mxu1 %v722_v19  ;;  %672 = vmatprep.subr.bf16.mxu0 %v758_v46 }
  0x67   :  { %385 = vmatprep.subr.bf16.mxu1 %v723_v20 }
  0x69   :  { %673 = vmatpush3.bf16.msra.mxu0 %v759_v47 }
  0x6a   :  { %386 = vmatpush1.bf16.msra.mxu1 %v725_v21  ;;  %674 = vmatprep.subr.bf16.mxu0 %v760_v48  ;;  %v647_v21 = vld [vmem:[%s1015_s6] ss:$0 sm:$0xff] }
  0x6b   :  { %387 = vmatprep.subr.bf16.mxu1 %v726_v22 }
  0x6d   :  { %675 = vmatpush3.bf16.msra.mxu0 %v761_v49 }
  0x6e   :  { %388 = vmatpush1.bf16.msra.mxu1 %v728_v23  ;;  %676 = vmatprep.subr.bf16.mxu0 %v762_v3 }
  0x6f   :  { %389 = vmatprep.subr.bf16.mxu1 %v729_v24 }
  0x71   :  { %677 = vmatpush3.bf16.msra.mxu0 %v763_v4 }
  0x72   :  { %390 = vmatpush1.bf16.msra.mxu1 %v731_v25  ;;  %678 = vmatprep.subr.bf16.mxu0 %v764_v5 }
  0x73   :  { %391 = vmatprep.subr.bf16.mxu1 %v732_v26 }
  0x75   :  { %679 = vmatpush3.bf16.msra.mxu0 %v765_v6 }
  0x76   :  { %392 = vmatpush1.bf16.msra.mxu1 %v734_v27 }
  0x77   :  { %393 = vmatprep.subr.bf16.mxu1 %v735_v28 }
  0x7a   :  { %394 = vmatpush1.bf16.msra.mxu1 %v737_v29 }
  0x7b   :  { %395 = vmatprep.subr.bf16.mxu1 %v738_v30 }
  0x7e   :  { %396 = vmatpush1.bf16.msra.mxu1 %v740_v31 }
  0x7f   :  { %397 = vmatprep.subr.bf16.mxu1 %v741_v32 }
  0x82   :  { %398 = vmatpush1.bf16.msra.mxu1 %v743_v33 }
  0x83   :  { %399 = vmatprep.subr.bf16.mxu1 %v744_v34 }
  0x86   :  { %400 = vmatpush1.bf16.msra.mxu1 %v746_v35 }
  0x87   :  { %401 = vmatprep.subr.bf16.mxu1 %v747_v36 }
  0x8a   :  { %402 = vmatpush1.bf16.msra.mxu1 %v749_v37 }
 0x126   :  { %v156_v57 = vpop.f32.mrb[0].mxu0 }
 0x127   :  { %v157_v58 = vadd.f32 %v156_v57, %v91_v55  ;;  %v158_v59 = vpop.f32.mrb[1].mxu0 }
 0x128   :  { %v159_v60 = vadd.f32 %v158_v59, %v95_v56  ;;  %v160_v61 = vpop.f32.mrb[2].mxu0 }
 0x129   :  { %v163_v62 = vmax.f32 %v157_v58, 0.0  ;;  %v161_v63 = vpop.f32.mrb[3].mxu0 }
 0x12a   :  { %v164_v0 = vmax.f32 %v159_v60, 0.0 }
 0x12b   :  { %v165_v2 = vpack.c.bf16 %v163_v62, %v163_v62 }
 0x12c   :  { %v166_v1 = vpack.c.bf16 %v164_v0, %v164_v0 }
 0x12e   :  { %403 = vmatprep.mubr.bf16.mxu1 %v166_v1 }
 0x12f   :  { %404 = vmatmul.mubr.bf16.vlgmr.msra.gmra.mrb[0].mxu1 %v165_v2 }
 0x202   :  { %v405_v10 = vpop.f32.mrb[0].mxu1 }
 0x203   :  { %v406_v11 = vadd.f32 %v405_v10, %v204_v8  ;;  %v407_v12 = vpop.f32.mrb[1].mxu1 }
 0x204   :  { %v408_v13 = vadd.f32 %v407_v12, %v208_v9  ;;  %v409_v14 = vpop.f32.mrb[2].mxu1 }
 0x205   :  { %v412_v15 = vmax.f32 %v406_v11, 0.0  ;;  %v410_v16 = vpop.f32.mrb[3].mxu1 }
 0x206   :  { %v413_v17 = vmax.f32 %v408_v13, 0.0 }
 0x207   :  { %v414_v19 = vpack.c.bf16 %v412_v15, %v412_v15 }
 0x208   :  { %v415_v18 = vpack.c.bf16 %v413_v17, %v413_v17 }
 0x20a   :  { %583 = vmatprep.mubr.bf16.mxu0 %v415_v18 }
 0x20b   :  { %584 = vmatmul.mubr.bf16.vlgmr.msra.gmra.mrb[4].mxu0 %v414_v19 }
 0x2de   :  { %v680_v20 = vpop.f32.mrb[4].mxu0 }
 0x2df   :  { %v681_v22 = vpop.f32.mrb[5].mxu0 }
 0x2e0   :  { %v682_v23 = vadd.f32 %v681_v22, %v680_v20  ;;  %v683_v24 = vpop.f32.mrb[6].mxu0 }
 0x2e1   :  { %v684_v25 = vpop.f32.mrb[7].mxu0 }
 0x2e2   :  { %v586_v26 = vadd.f32 %v682_v23, %v647_v21 }
 0x2e4   :  { %v591_v27 = vpack.c.bf16 %v586_v26, %v586_v26 }
 0x2e6   :  { %592 = vst [vmem:[#allocation10] sm:$0xf] %v591_v27 }
 0x2e7   :  { %865 = shalt.err (!%p862_p8)
}
 0x2e8   :  { %s866_s6 = scalar_lea.hbm %s1016_s7, 64 }
 0x2e9   :  { %p867_p9 = scmp.ne.s32.totalorder %s1016_s7, %s866_s6  ;;  %p870_p10 = scmp.lt.u32.totalorder %s866_s6, %s1016_s7 }
 0x2eb   :  { %p872_p11 = pnand %p870_p10, %p867_p9 }
 0x2ed   :  { %875 = shalt.err (!%p872_p11)
}
 0x2ee   :  { %602 = dma.vmem_to_hbm [thread:$0]  %s600_s30, 64, %s1016_s7, [#allocation4]  }
 0x2ef   :  { %882 = dma.done.wait [#allocation4], 64  }
 0x2f0   :  { %883 = vsyncadd [#allocation4], 4294967232 }
 0x2f1   :  { %606 = vsyncpa [#allocation3], 1 }
 0x2f2   :  { %607 = vsyncpa [#allocation6], 1 }
 0x2f3   :  { %608 = vsyncpa [#allocation9], 1 }
 0x2f4   :  { %609 = vsyncpa [#allocation4], 1 }

</bundles_post_ra>
